<compile_context>
chip_gen: v7x
topology: tpu7x:2x2x1
jax: 0.10.0
libtpu: 0.0.40
codegen_flags: <defaults>
</compile_context>

<pallas_src>
import math
import functools

import jax
import jax.numpy as jnp
from jax.experimental import pallas as pl
from jax.experimental.pallas import tpu as pltpu


# ----------------------------------------------------------------------------
# helpers
# ----------------------------------------------------------------------------
def _pick_tile(dim, target, align=8):
    """Largest tile <= target that divides `dim` and is a multiple of `align`;
    falls back to the full dimension (full blocks are always legal)."""
    if dim <= target:
        return dim
    for t in range(target, align - 1, -1):
        if dim % t == 0 and t % align == 0:
            return t
    return dim


def _vmem_limit(*block_bytes):
    # double-buffered blocks + headroom; clamp to [32 MiB, 64 MiB] (v7x physical).
    need = 2 * sum(block_bytes) + (4 << 20)
    return int(min(max(need, 32 << 20), 64 << 20))


# ----------------------------------------------------------------------------
# 1) KV projection: x (B, M, E) @ per-head weights -> k, v in (B, H, M, D)
# ----------------------------------------------------------------------------
def _kv_proj_kernel(x_ref, wk_ref, wv_ref, k_ref, v_ref):
    x = x_ref[...]                                           # (tm, E), native dtype
    k_ref[...] = jnp.dot(x, wk_ref[...],
                         preferred_element_type=jnp.float32).astype(k_ref.dtype)
    v_ref[...] = jnp.dot(x, wv_ref[...],
                         preferred_element_type=jnp.float32).astype(v_ref.dtype)


def kv_proj_pallas(x, wk, wv):
    """x: (B, M, E); wk, wv: (H, E, D)  ->  k, v: (B, H, M, D)."""
    B, M, E = x.shape
    H, _, D = wk.shape
    tm = _pick_tile(M, 512)
    itm = jnp.dtype(x.dtype).itemsize
    vmem = _vmem_limit(tm * E * itm, 2 * E * D * itm, 2 * tm * D * itm)
    return pl.pallas_call(
        _kv_proj_kernel,
        out_shape=(jax.ShapeDtypeStruct((B, H, M, D), x.dtype),
                   jax.ShapeDtypeStruct((B, H, M, D), x.dtype)),
        grid=(B, M // tm, H),
        in_specs=[
            pl.BlockSpec((None, tm, E), lambda b, mt, h: (b, mt, 0)),
            pl.BlockSpec((None, E, D), lambda b, mt, h: (h, 0, 0)),
            pl.BlockSpec((None, E, D), lambda b, mt, h: (h, 0, 0)),
        ],
        out_specs=(
            pl.BlockSpec((None, None, tm, D), lambda b, mt, h: (b, h, mt, 0)),
            pl.BlockSpec((None, None, tm, D), lambda b, mt, h: (b, h, mt, 0)),
        ),
        compiler_params=pltpu.CompilerParams(
            dimension_semantics=("parallel", "parallel", "parallel"),
            vmem_limit_bytes=vmem,
        ),
    )(x, wk, wv)


# ----------------------------------------------------------------------------
# 2) Attention: per-(batch, head, query-tile) softmax(q k^T / sqrt(D)) v
# ----------------------------------------------------------------------------
def _attention_kernel(scale, has_bias, *refs):
    if has_bias:
        q_ref, k_ref, v_ref, bias_ref, attn_ref, o_ref = refs
    else:
        q_ref, k_ref, v_ref, attn_ref, o_ref = refs

    q = q_ref[...] * scale                                   # pre-scale query
    # NT matmul: contract the last dim of (tq, D) with the last dim of (M, D).
    s = jax.lax.dot_general(q, k_ref[...], (((1,), (1,)), ((), ())),
                            preferred_element_type=jnp.float32)   # (tq, M) f32
    if has_bias:
        s = s + bias_ref[...]                                # additive 0 / -inf mask
    # numerically stable softmax in f32 (fully-masked rows give NaN, like torch).
    m = jnp.max(s, axis=-1, keepdims=True)
    e = jnp.exp(s - m)
    p = e * pl.reciprocal(jnp.sum(e, axis=-1, keepdims=True), approx=True)
    attn_ref[...] = p.astype(attn_ref.dtype)
    o_ref[...] = jnp.dot(p.astype(v_ref.dtype), v_ref[...],
                         preferred_element_type=jnp.float32).astype(o_ref.dtype)


def attention_pallas(q, k, v, bias=None):
    """q: (B, H, N, D), k/v: (B, H, M, D), bias: optional (B, N, M) additive mask.
    Returns (attn (B, H, N, M) in q.dtype, o (B, H, N, D))."""
    B, H, N, D = q.shape
    M = k.shape[2]
    tq = _pick_tile(N, 256)
    has_bias = bias is not None
    kern = functools.partial(_attention_kernel, 1.0 / math.sqrt(D), has_bias)

    in_specs = [
        pl.BlockSpec((None, None, tq, D), lambda b, h, nt: (b, h, nt, 0)),
        pl.BlockSpec((None, None, M, D), lambda b, h, nt: (b, h, 0, 0)),
        pl.BlockSpec((None, None, M, D), lambda b, h, nt: (b, h, 0, 0)),
    ]
    args = [q, k, v]
    if has_bias:
        in_specs.append(pl.BlockSpec((None, tq, M), lambda b, h, nt: (b, nt, 0)))
        args.append(bias)

    itm = jnp.dtype(q.dtype).itemsize
    vmem = _vmem_limit(tq * D * itm, 2 * M * D * itm, tq * M * 4,
                       tq * M * itm, tq * D * itm)

    attn, o = pl.pallas_call(
        kern,
        out_shape=(jax.ShapeDtypeStruct((B, H, N, M), q.dtype),
                   jax.ShapeDtypeStruct((B, H, N, D), q.dtype)),
        grid=(B, H, N // tq),
        in_specs=in_specs,
        out_specs=(
            pl.BlockSpec((None, None, tq, M), lambda b, h, nt: (b, h, nt, 0)),
            pl.BlockSpec((None, None, tq, D), lambda b, h, nt: (b, h, nt, 0)),
        ),
        compiler_params=pltpu.CompilerParams(
            dimension_semantics=("parallel", "parallel", "parallel"),
            vmem_limit_bytes=vmem,
        ),
    )(*args)
    return attn, o


# ----------------------------------------------------------------------------
# 3) Output projection with fused head reduction: (B, H, N, D) -> (B, N, E)
# ----------------------------------------------------------------------------
def _out_proj_kernel(o_ref, w_ref, b_ref, out_ref, acc_ref):
    h = pl.program_id(2)

    @pl.when(h == 0)
    def _():
        acc_ref[...] = jnp.zeros_like(acc_ref)

    acc_ref[...] += jnp.dot(o_ref[...], w_ref[...],
                            preferred_element_type=jnp.float32)

    @pl.when(h == pl.num_programs(2) - 1)
    def _():
        out_ref[...] = (acc_ref[...] + b_ref[...]).astype(out_ref.dtype)


def out_proj_pallas(o, w, b):
    """o: (B, H, N, D), w: (H, D, E), b: (E,) -> (B, N, E)."""
    B, H, N, D = o.shape
    E = w.shape[2]
    tq = _pick_tile(N, 256)
    itm = jnp.dtype(o.dtype).itemsize
    vmem = _vmem_limit(tq * D * itm, D * E * itm, E * 4, tq * E * itm, tq * E * 4)
    return pl.pallas_call(
        _out_proj_kernel,
        out_shape=jax.ShapeDtypeStruct((B, N, E), o.dtype),
        grid=(B, N // tq, H),
        in_specs=[
            pl.BlockSpec((None, None, tq, D), lambda b, nt, h: (b, h, nt, 0)),
            pl.BlockSpec((None, D, E), lambda b, nt, h: (h, 0, 0)),
            pl.BlockSpec((1, E), lambda b, nt, h: (0, 0)),
        ],
        out_specs=pl.BlockSpec((None, tq, E), lambda b, nt, h: (b, nt, 0)),
        scratch_shapes=[pltpu.VMEM((tq, E), jnp.float32)],
        compiler_params=pltpu.CompilerParams(
            dimension_semantics=("parallel", "parallel", "arbitrary"),
            vmem_limit_bytes=vmem,
        ),
    )(o, w, b.reshape(1, E))


# ----------------------------------------------------------------------------
# Module wrapper (parameter setup + glue)
# ----------------------------------------------------------------------------
class MultiHeadAttention:
    def __init__(self, embedding_dim, num_attention_heads, *, head_size=None,
                 bias=True, dropout=0.0, key=None):
        if head_size is None:
            head_size, rem = divmod(embedding_dim, num_attention_heads)
            if rem > 0:
                raise ValueError(
                    f"{embedding_dim} is not a multiple of {num_attention_heads}.")
        self.embedding_dim = embedding_dim
        self.head_size = head_size
        self.num_attention_heads = num_attention_heads
        self.dropout = dropout  # p=0.0 / eval -> identity

        k1, k2 = jax.random.split(key)
        H, D, E = num_attention_heads, head_size, embedding_dim

        # torch nn.Linear kv.weight layout: (2*H*D, E); rows [0, H*D) are keys,
        # rows [H*D, 2*H*D) are values ('B N (S H D)' ordering).  Pre-split and
        # pre-transpose into matmul layout (H, E, D) once, at init.
        stdv = 1.0 / math.sqrt(head_size)
        kv_w = jax.random.uniform(k1, (2 * H * D, E), jnp.float32,
                                  minval=-stdv, maxval=stdv)
        self.wk = jnp.swapaxes(kv_w[: H * D].reshape(H, D, E), 1, 2)   # (H, E, D)
        self.wv = jnp.swapaxes(kv_w[H * D:].reshape(H, D, E), 1, 2)    # (H, E, D)

        # torch prj.weight layout: (E, H*D) -> matmul layout (H*D, E), split per head.
        stdv = 1.0 / math.sqrt(embedding_dim)
        prj_w = jax.random.uniform(k2, (E, H * D), jnp.float32,
                                   minval=-stdv, maxval=stdv)
        self.w_prj = prj_w.T.reshape(H, D, E)                          # (H, D, E)
        # torch zeroes the bias at reset; bias=False is identical to adding zeros.
        self.prj_bias = jnp.zeros((E,), jnp.float32)

    def __call__(self, que, x, mask=None):
        B, N, _ = que.shape
        H, D = self.num_attention_heads, self.head_size

        # kv projection, written directly in (B, H, M, D) layout (no 5-D transpose)
        k, v = kv_proj_pallas(x, self.wk, self.wv)

        # 'B N (H D) -> B H N D' for the (small) query tensor
        q = que.reshape(B, N, H, D).transpose(0, 2, 1, 3)

        bias = None
        if mask is not None:
            # masked_fill(mask, -inf) as an additive bias, broadcast over heads
            bias = jnp.where(mask.astype(bool), -jnp.inf, 0.0).astype(jnp.float32)

        attn, o = attention_pallas(q, k, v, bias)

        # output projection + head reduction fused in one kernel
        out = out_proj_pallas(o, self.w_prj, self.prj_bias)

        # dropout with p=0.0 (module default / eval mode) is the identity
        # TODO(synk): training-mode dropout with p>0 is not implemented.
        return out, attn


# ----------------------------------------------------------------------------
# Pure-JAX reference for validation
# ----------------------------------------------------------------------------
def reference_forward(mod, que, x, mask=None):
    B, N, _ = que.shape
    H, D = mod.num_attention_heads, mod.head_size
    k = jnp.einsum("bme,hed->bhmd", x, mod.wk)
    v = jnp.einsum("bme,hed->bhmd", x, mod.wv)
    q = que.reshape(B, N, H, D).transpose(0, 2, 1, 3)
    dots = jnp.einsum("bhnd,bhmd->bhnm", q, k)
    if mask is not None:
        dots = jnp.where(mask.astype(bool)[:, None, :, :], -jnp.inf, dots)
    attn = jax.nn.softmax(dots / math.sqrt(D), axis=-1)
    mha = jnp.einsum("bhnm,bhmd->bhnd", attn, v)
    out = jnp.einsum("bhnd,hde->bne", mha, mod.w_prj) + mod.prj_bias
    return out, attn


if __name__ == "__main__":
    # small shapes: batch=2, seq(query)=8, seq(key/value)=8, embed=32, heads=4
    B, N, M, E, H = 2, 8, 8, 32, 4

    root = jax.random.PRNGKey(0)
    k_params, k_q, k_x, k_m = jax.random.split(root, 4)

    mod = MultiHeadAttention(E, H, bias=True, dropout=0.0, key=k_params)

    que = jax.random.normal(k_q, (B, N, E), jnp.float32)
    x = jax.random.normal(k_x, (B, M, E), jnp.float32)

    # ---- no-mask path -------------------------------------------------------
    out, attn = mod(que, x, mask=None)
    out = jax.block_until_ready(out)
    attn = jax.block_until_ready(attn)
    ref_out, ref_attn = reference_forward(mod, que, x, mask=None)
    assert out.shape == (B, N, E) and attn.shape == (B, H, N, M)
    assert jnp.allclose(out, ref_out, atol=5e-3, rtol=5e-3)
    assert jnp.allclose(attn, ref_attn, atol=5e-3, rtol=5e-3)

    # ---- masked path (column 0 kept visible so no row is fully masked) ------
    mask = jax.random.bernoulli(k_m, 0.5, (B, N, M)).at[..., 0].set(False)
    out_m, attn_m = mod(que, x, mask=mask)
    out_m = jax.block_until_ready(out_m)
    attn_m = jax.block_until_ready(attn_m)
    ref_out_m, ref_attn_m = reference_forward(mod, que, x, mask=mask)
    assert jnp.allclose(out_m, ref_out_m, atol=5e-3, rtol=5e-3)
    assert jnp.allclose(attn_m, ref_attn_m, atol=5e-3, rtol=5e-3)

    print("KERNEL_OK")
</pallas_src>

<mosaic_0001>
module attributes {stable_mosaic.version = 11 : i64} {
  func.func @_kv_proj_kernel(%arg0: i32, %arg1: i32, %arg2: i32, %arg3: memref<1x8x32xf32, #tpu.memory_space<vmem>>, %arg4: memref<1x32x8xf32, #tpu.memory_space<vmem>>, %arg5: memref<1x32x8xf32, #tpu.memory_space<vmem>>, %arg6: memref<1x1x8x8xf32, #tpu.memory_space<vmem>>, %arg7: memref<1x1x8x8xf32, #tpu.memory_space<vmem>>) attributes {dimension_semantics = [#tpu.dimension_semantics<parallel>, #tpu.dimension_semantics<parallel>, #tpu.dimension_semantics<parallel>], iteration_bounds = array<i64: 2, 1, 4>, scalar_prefetch = 0 : i64, scratch_operands = 0 : i64, tpu.core_type = #tpu.core_type<tc>, window_params = [{transform_indices = @transform_0, window_bounds = array<i64: 1, 8, 32>}, {transform_indices = @transform_1, window_bounds = array<i64: 1, 32, 8>}, {transform_indices = @transform_2, window_bounds = array<i64: 1, 32, 8>}, {transform_indices = @transform_3, window_bounds = array<i64: 1, 1, 8, 8>}, {transform_indices = @transform_4, window_bounds = array<i64: 1, 1, 8, 8>}]} {
    %c0 = arith.constant 0 : index
    %c0_0 = arith.constant 0 : index
    %c0_1 = arith.constant 0 : index
    %0 = vector.load %arg3[%c0, %c0_0, %c0_1] : memref<1x8x32xf32, #tpu.memory_space<vmem>>, vector<1x8x32xf32>
    %1 = vector.shape_cast %0 : vector<1x8x32xf32> to vector<8x32xf32>
    %c0_2 = arith.constant 0 : index
    %c0_3 = arith.constant 0 : index
    %c0_4 = arith.constant 0 : index
    %2 = vector.load %arg4[%c0_2, %c0_3, %c0_4] : memref<1x32x8xf32, #tpu.memory_space<vmem>>, vector<1x32x8xf32>
    %3 = vector.shape_cast %2 : vector<1x32x8xf32> to vector<32x8xf32>
    %cst = arith.constant dense<0.000000e+00> : vector<8x8xf32>
    %4 = tpu.matmul %1, %3, %cst {dimension_numbers = #tpu.dot_dimension_numbers<[1], [0], [0], [1], [0, 0, 1, 1], [], []>} : vector<8x32xf32>, vector<32x8xf32>, vector<8x8xf32> -> vector<8x8xf32>
    %c0_5 = arith.constant 0 : index
    %c0_6 = arith.constant 0 : index
    %c0_7 = arith.constant 0 : index
    %c0_8 = arith.constant 0 : index
    %5 = vector.load %arg6[%c0_5, %c0_6, %c0_7, %c0_8] : memref<1x1x8x8xf32, #tpu.memory_space<vmem>>, vector<1x1x8x8xf32>
    %6 = vector.shape_cast %5 : vector<1x1x8x8xf32> to vector<8x8xf32>
    %7 = vector.shape_cast %4 : vector<8x8xf32> to vector<1x1x8x8xf32>
    tpu.vector_store %arg6[%c0_5, %c0_6, %c0_7, %c0_8], %7 {strides = array<i32>} : memref<1x1x8x8xf32, #tpu.memory_space<vmem>>, vector<1x1x8x8xf32>,
    %c0_9 = arith.constant 0 : index
    %c0_10 = arith.constant 0 : index
    %c0_11 = arith.constant 0 : index
    %8 = vector.load %arg5[%c0_9, %c0_10, %c0_11] : memref<1x32x8xf32, #tpu.memory_space<vmem>>, vector<1x32x8xf32>
    %9 = vector.shape_cast %8 : vector<1x32x8xf32> to vector<32x8xf32>
    %cst_12 = arith.constant dense<0.000000e+00> : vector<8x8xf32>
    %10 = tpu.matmul %1, %9, %cst_12 {dimension_numbers = #tpu.dot_dimension_numbers<[1], [0], [0], [1], [0, 0, 1, 1], [], []>} : vector<8x32xf32>, vector<32x8xf32>, vector<8x8xf32> -> vector<8x8xf32>
    %c0_13 = arith.constant 0 : index
    %c0_14 = arith.constant 0 : index
    %c0_15 = arith.constant 0 : index
    %c0_16 = arith.constant 0 : index
    %11 = vector.load %arg7[%c0_13, %c0_14, %c0_15, %c0_16] : memref<1x1x8x8xf32, #tpu.memory_space<vmem>>, vector<1x1x8x8xf32>
    %12 = vector.shape_cast %11 : vector<1x1x8x8xf32> to vector<8x8xf32>
    %13 = vector.shape_cast %10 : vector<8x8xf32> to vector<1x1x8x8xf32>
    tpu.vector_store %arg7[%c0_13, %c0_14, %c0_15, %c0_16], %13 {strides = array<i32>} : memref<1x1x8x8xf32, #tpu.memory_space<vmem>>, vector<1x1x8x8xf32>,
    return
  }
  func.func @transform_0(%arg0: i32, %arg1: i32, %arg2: i32) -> (i32, i32, i32) {
    %c0_i32 = arith.constant 0 : i32
    %c0_i32_0 = arith.constant 0 : i32
    return %arg0, %arg1, %c0_i32 : i32, i32, i32
  }
  func.func @transform_1(%arg0: i32, %arg1: i32, %arg2: i32) -> (i32, i32, i32) {
    %c0_i32 = arith.constant 0 : i32
    %c0_i32_0 = arith.constant 0 : i32
    %c0_i32_1 = arith.constant 0 : i32
    return %arg2, %c0_i32, %c0_i32_0 : i32, i32, i32
  }
  func.func @transform_2(%arg0: i32, %arg1: i32, %arg2: i32) -> (i32, i32, i32) {
    %c0_i32 = arith.constant 0 : i32
    %c0_i32_0 = arith.constant 0 : i32
    %c0_i32_1 = arith.constant 0 : i32
    return %arg2, %c0_i32, %c0_i32_0 : i32, i32, i32
  }
  func.func @transform_3(%arg0: i32, %arg1: i32, %arg2: i32) -> (i32, i32, i32, i32) {
    %c0_i32 = arith.constant 0 : i32
    %c0_i32_0 = arith.constant 0 : i32
    return %arg0, %arg2, %arg1, %c0_i32 : i32, i32, i32, i32
  }
  func.func @transform_4(%arg0: i32, %arg1: i32, %arg2: i32) -> (i32, i32, i32, i32) {
    %c0_i32 = arith.constant 0 : i32
    %c0_i32_0 = arith.constant 0 : i32
    return %arg0, %arg2, %arg1, %c0_i32 : i32, i32, i32, i32
  }
}

</mosaic_0001>

<bundles_post_ra>
// kernel: tpu_custom_call.1
= control target key start
LH: loop header
LB: loop body
LE: loop exit
PB: predicated region body
PF: predicated region fallthrough
CT: control target
= control target key end

     0   :  { %10 = vsyncpa [#allocation3], 0  ;;  %s1095_s0 = inlined_call_operand.vmem [shape: f32[2,8,32], index: 0, kind: input, shape index: {}]   ;;  %s1096_s1 = inlined_call_operand.vmem [shape: f32[4,32,8], index: 1, kind: input, shape index: {}]   ;;  %s1097_s2 = inlined_call_operand.vmem [shape: f32[4,32,8], index: 2, kind: input, shape index: {}]   ;;  %s1098_s3 = inlined_call_operand.hbm [shape: f32[2,4,8,8], index: 3, kind: output, shape index: {0}]   ;;  %s1099_s4 = inlined_call_operand.hbm [shape: f32[2,4,8,8], index: 4, kind: output, shape index: {1}]  }
   0x1   :  { %12 = vsyncpa [#allocation3 + $0x1], 0 }
   0x2   :  { %13 = vsyncpa [#allocation5], 0 }
   0x3   :  { %15 = vsyncpa [#allocation5 + $0x1], 0  ;;  %s919_s15 = smov 0   ;;  %s921_s16 = smov 0  }
   0x4   :  { %s923_s17 = smov 0   ;;  %s925_s18 = smov 0  }
   0x5   :  { %s927_s19 = smov 0   ;;  %s929_s20 = smov 0  }
   0x6   :  { %s931_s21 = smov 0   ;;  %s933_s22 = smov 0  }
   0x7 LB: > { %s614_s23 = sadd.s32 4294967295, %s887_s22   ;;  %s615_s24 = sadd.s32 4294967294, %s887_s22   ;;  %s887_s22 = sphi %s933_s22, %s21_s22   ;;  %s883_s21 = sphi %s931_s21, %s1108_s21   ;;  %s879_s20 = sphi %s929_s20, %s1107_s20   ;;  %s875_s19 = sphi %s927_s19, %s1106_s19   ;;  %s871_s18 = sphi %s925_s18, %s1105_s18   ;;  %s867_s17 = sphi %s923_s17, %s1104_s17   ;;  %s863_s16 = sphi %s921_s16, %s1103_s16   ;;  %s859_s15 = sphi %s919_s15, %s1102_s15  }
   0x8   : > { %s33_s25 = sadd.s32 1, %s879_s20  ;;  %s40_s26 = sadd.s32 1, %s883_s21 }
   0x9   : > { %p34_p0 = scmp.ge.s32.totalorder %s33_s25, 4  ;;  %p141_p1 = scmp.ne.s32.totalorder %s867_s17, %s863_s16 }
   0xa   : > { %p142_p2 = scmp.eq.s32.totalorder %s614_s23, 7  ;;  %p147_p5 = scmp.ne.s32.totalorder %s863_s16, %s859_s15 }
   0xb   : > { %s1110_s25 = smov (%p34_p0, %s33_s25), 0  ;;  %s1112_s26 = smov (!%p34_p0, %s40_s26), %s883_s21 }
   0xc   : > { %s125_s27 = ssub.s32 %s879_s20, %s1110_s25  ;;  %p970_p3 = por %p142_p2, %p141_p1 }
   0xd   : > { %p42_p4 = scmp.ge.s32.totalorder %s1112_s26, 2  ;;  %p148_p6 = scmp.eq.s32.totalorder %s615_s24, 7 }
   0xe   : > { %p618_p7 = scmp.ge.s32.totalorder %s887_s22, 1  ;;  %p222_p9 = scmp.lt.s32.totalorder %s887_s22, 9 }
   0xf   : > { %s1114_s26 = smov (%p42_p4, %s1112_s26), 0  ;;  %p979_p8 = por %p148_p6, %p147_p5 }
  0x10   : > { %s124_s30 = ssub.s32 %s883_s21, %s1114_s26  ;;  %s131_s5 = sadd.s32 1, %s867_s17 }
  0x11   : > { %s126_s6 = sor.u32 %s125_s27, %s124_s30  ;;  %p223_p10 = pnand %p618_p7, %p222_p9 }
  0x12   : > { %p129_p11 = scmp.eq.s32.totalorder %s126_s6, 0  ;;  %p272_p12 = scmp.lt.s32.totalorder (!%p223_p10), %s871_s18, 3  ;;  %v889_v0 = vmov (!%p223_p10), 0.0|0.0   ;;  %vm890_vm0 = vmmov (!%p223_p10), 0   ;;  %v891_v1 = vmov (!%p223_p10), 0.0   ;;  %vm287_vm1 = vcmask (!%p223_p10), 261120  }
  0x13   : > { %226 = sbr.rel (%p223_p10) target bundleno = 290 (0x122), region = 32  ;;  %p265_p13 = scmp.lt.s32.totalorder (!%p223_p10), %s875_s19, 1  ;;  %670 = vmatprep.subr.bf16.mxu0 (!%p223_p10), %v889_v0  ;;  %676 = vmatprep.subr.bf16.mxu1 (!%p223_p10), %v889_v0  ;;  %vm361_vm2 = vcmask (!%p223_p10), 64512  }
  0x14   : > { %s988_s7 = scalar_select %p129_p11, %s867_s17, %s131_s5  }
  0x15   : > { %656 = vmatprep.mubr.msk.f32.mxu0 (!%p223_p10), %vm890_vm0, %v891_v1  ;;  %667 = vmatprep.mubr.msk.f32.mxu1 (!%p223_p10), %vm890_vm0, %v891_v1 }
  0x1a   : > { %s273_s8 = scalar_select %p272_p12, %s871_s18, 3 }
  0x1b   : > { %s266_s9 = scalar_select %p265_p13, %s875_s19, 1 }
  0x1c   : > { %s636_s10 = sshll.u32 %s273_s8, 5  ;;  %s1004_s8 = sand.u32 1, %s863_s16  }
  0x1d   : > { %s276_s13 = scalar_lea.vmem %s1096_s1, %s636_s10  ;;  %s281_s24 = scalar_lea.vmem %s1097_s2, %s636_s10 }
  0x1e   : > { %v283_v2 = vld [vmem:[%s276_s13] sm:$0xff]  ;;  %v284_v3 = vld [vmem:[%s276_s13 + $0x8] sm:$0xff]  ;;  %v285_v7 = vld [vmem:[%s276_s13 + $0x10] sm:$0xff]  ;;  %s621_s27 = sshll.u32 %s266_s9, 3  ;;  %s630_s9 = sshll.u32 %s875_s19, 2 }
  0x1f   : > { %v363_v4 = vld [vmem:[%s281_s24] sm:$0xff]  ;;  %v671_v5 = vpack.c.bf16 %v284_v3, %v283_v2  ;;  %v364_v6 = vld [vmem:[%s281_s24 + $0x8] sm:$0xff]  ;;  %v286_v8 = vld [vmem:[%s276_s13 + $0x18] sm:$0xff]  ;;  %s271_s6 = scalar_lea.vmem %s1095_s0, %s621_s27  ;;  %s619_s10 = sshll.u32 %s1004_s8, 3 }
  0x20   : > { %v677_v9 = vpack.c.bf16 %v364_v6, %v363_v4  ;;  %v365_v10 = vld [vmem:[%s281_s24 + $0x10] sm:$0xff]  ;;  %v366_v11 = vld [vmem:[%s281_s24 + $0x18] sm:$0xff]  ;;  %v674_v12 = vpack.c.bf16 %v286_v8, %v285_v7  ;;  %v282_v14 = vld [vmem:[%s271_s6] sm:$0xff]  ;;  %s456_s11 = sadd.s32 %s871_s18, %s630_s9  ;;  %s257_s13 = scalar_lea.vmem [#allocation2], %s619_s10 }
  0x21   : > { %672 = vmatpush3.bf16.msra.mxu0 %v671_v5  ;;  %v680_v13 = vpack.c.bf16 %v366_v11, %v365_v10  ;;  %s631_s12 = sshll.u32 %s456_s11, 7  ;;  %s460_s14 = sshll.u32 %s257_s13, 4  ;;  %s1014_s14 = int_to_ptr.vmem [resolvable:$true] %s460_s14 }
  0x22   : > { %678 = vmatpush3.bf16.msra.mxu1 %v677_v9  ;;  %673 = vmatprep.subr.bf16.mxu0 %v889_v0  ;;  %s264_s23 = scalar_lea.vmem [#allocation4], %s619_s10  ;;  %s1012_s5 = scalar_lea.hbm %s1098_s3, %s631_s12 }
  0x23   : > { %679 = vmatprep.subr.bf16.mxu1 %v889_v0  ;;  %s476_s24 = sshll.u32 %s264_s23, 4  ;;  %s1019_s6 = scalar_lea.hbm %s1099_s4, %s631_s12  ;;  %s1021_s24 = int_to_ptr.vmem [resolvable:$true] %s476_s24 }
  0x24   : > { %s439_s9 = scalar_lea.sflag [#allocation3], %s1004_s8  ;;  %s761_s10 = scalar_lea.vmem %s1014_s14, 128 }
  0x25   : > { %675 = vmatpush3.bf16.msra.mxu0 %v674_v12  ;;  %p762_p0 = scmp.ne.s32.totalorder %s1014_s14, %s761_s10  ;;  %s892_s11 = smov [#allocation2]  }
  0x26   : > { %681 = vmatpush3.bf16.msra.mxu1 %v680_v13  ;;  %s765_s27 = sshll.u32 %s892_s11, 4  ;;  %s766_s27 = int_to_ptr.vmem [resolvable:$false] %s765_s27 }
  0x27   : > { %p763_p1 = pnand %p762_p0, %p970_p3  ;;  %s767_s30 = scalar_lea.vmem %s766_s27, 256 }
  0x28   : > { %657 = vmatmul.mubr.msk.f32.vlgmr.msra.gmra.mrb[0].mxu0 %vm287_vm1, %v282_v14  ;;  %p768_p4 = scmp.lt.s32.totalorder %s1014_s14, %s766_s27  ;;  %p769_p5 = scmp.lt.s32.totalorder %s767_s30, %s761_s10 }
  0x29   : > { %668 = vmatmul.mubr.msk.f32.vlgmr.msra.gmra.mrb[0].mxu1 %vm287_vm1, %v282_v14  ;;  %p764_p2 = pneg %p763_p1 }
  0x2a   : > { %p770_p6 = por %p769_p5, %p768_p4 }
  0x2c   : > { %p771_p7 = pnand %p770_p6, %p764_p2 }
  0xfb   : > { %v357_v15 = vpop.f32.mrb[0].mxu0 }
  0xfc   : > { %362 = vst.msk [vmem:[%s257_s13] sm:$0xff] %vm361_vm2, %v357_v15  ;;  %v433_v16 = vpop.f32.mrb[0].mxu1  ;;  %v658_v17 = vpop.f32.mrb[1].mxu0 }
  0xfd   : > { %437 = vst.msk [vmem:[%s264_s23] sm:$0xff] %vm361_vm2, %v433_v16  ;;  %v669_v18 = vpop.f32.mrb[1].mxu1 }
  0xfe   : > { %774 = shalt.err (!%p771_p7)
}
  0xff   : > { %s775_s12 = scalar_lea.hbm %s1012_s5, 128  ;;  %s779_s19 = scalar_lea.hbm %s1098_s3, 1024 }
 0x100   : > { %p776_p9 = scmp.ne.s32.totalorder %s1012_s5, %s775_s12  ;;  %p780_p12 = scmp.lt.u32.totalorder %s1012_s5, %s1098_s3 }
 0x101   : > { %p781_p13 = scmp.lt.u32.totalorder %s779_s19, %s775_s12  ;;  %p783_p1 = scmp.lt.u32.totalorder %s775_s12, %s1012_s5 }
 0x102   : > { %p777_p10 = pnand %p776_p9, %p970_p3 }
 0x103   : > { %p782_p0 = por %p781_p13, %p780_p12 }
 0x104   : > { %p778_p11 = pneg %p777_p10 }
 0x105   : > { %p784_p2 = por %p783_p1, %p782_p0 }
 0x107   : > { %p785_p4 = pnand %p784_p2, %p778_p11 }
 0x109   : > { %788 = shalt.err (!%p785_p4)
}
 0x10a   : > { %682 = dma.vmem_to_hbm [thread:$0]  (%p970_p3), %s1014_s14, 128, %s1012_s5, %s439_s9  }
 0x10b   : > { %s444_s10 = scalar_lea.sflag [#allocation5], %s1004_s8  ;;  %s789_s27 = scalar_lea.vmem %s1021_s24, 128 }
 0x10c   : > { %p790_p5 = scmp.ne.s32.totalorder %s1021_s24, %s789_s27  ;;  %s893_s30 = smov [#allocation4]  }
 0x10d   : > { %s793_s12 = sshll.u32 %s893_s30, 4  ;;  %s794_s12 = int_to_ptr.vmem [resolvable:$false] %s793_s12 }
 0x10e   : > { %p791_p6 = pnand %p790_p5, %p970_p3  ;;  %s795_s13 = scalar_lea.vmem %s794_s12, 256 }
 0x10f   : > { %p796_p9 = scmp.lt.s32.totalorder %s1021_s24, %s794_s12  ;;  %p797_p10 = scmp.lt.s32.totalorder %s795_s13, %s789_s27 }
 0x110   : > { %p792_p7 = pneg %p791_p6 }
 0x111   : > { %p798_p11 = por %p797_p10, %p796_p9 }
 0x113   : > { %p799_p12 = pnand %p798_p11, %p792_p7 }
 0x115   : > { %802 = shalt.err (!%p799_p12)
}
 0x116   : > { %s803_s8 = scalar_lea.hbm %s1019_s6, 128  ;;  %s807_s9 = scalar_lea.hbm %s1099_s4, 1024 }
 0x117   : > { %p804_p13 = scmp.ne.s32.totalorder %s1019_s6, %s803_s8  ;;  %p808_p2 = scmp.lt.u32.totalorder %s1019_s6, %s1099_s4 }
 0x118   : > { %p809_p4 = scmp.lt.u32.totalorder %s807_s9, %s803_s8  ;;  %p811_p6 = scmp.lt.u32.totalorder %s803_s8, %s1019_s6 }
 0x119   : > { %p805_p0 = pnand %p804_p13, %p970_p3 }
 0x11a   : > { %p810_p5 = por %p809_p4, %p808_p2 }
 0x11b   : > { %p806_p1 = pneg %p805_p0 }
 0x11c   : > { %p812_p7 = por %p811_p6, %p810_p5 }
 0x11e   : > { %p813_p9 = pnand %p812_p7, %p806_p1 }
 0x120   : > { %816 = shalt.err (!%p813_p9)
}
 0x121   : > { %683 = dma.vmem_to_hbm [thread:$0]  (%p970_p3), %s1021_s24, 128, %s1019_s6, %s444_s10  }
 0x122 PF: > { %p693_p10 = scmp.ge.s32.totalorder %s887_s22, 2  ;;  %s488_s18 = sand.u32 1, %s859_s15  }
 0x123   : > { %s489_s11 = scalar_lea.sflag [#allocation3], %s488_s18 }
 0x124   : > { %p687_p11 = pnand %p693_p10, %p979_p8 }
 0x126   : > { %850 = dma.done.wait (!%p687_p11), %s489_s11, 128  }
 0x127   : > { %852 = vsyncadd (!%p687_p11), %s489_s11, 4294967168  ;;  %s498_s27 = scalar_lea.sflag [#allocation5], %s488_s18 }
 0x128   : > { %854 = dma.done.wait (!%p687_p11), %s498_s27, 128  }
 0x129   : > { %856 = vsyncadd (!%p687_p11), %s498_s27, 4294967168  ;;  %s21_s22 = sadd.s32 1, %s887_s22   ;;  %s1102_s15 = smov %s863_s16 }
 0x12a   : > { %p18_p12 = scmp.ge.s32.totalorder %s21_s22, 10   ;;  %s1103_s16 = smov %s867_s17 }
 0x12b   : > { %s1104_s17 = smov %s988_s7  ;;  %s1105_s18 = smov %s879_s20 }
 0x12c   : > { %s1106_s19 = smov %s883_s21  ;;  %s1107_s20 = smov %s1110_s25 }
 0x12d   : > { %s1108_s21 = smov %s1114_s26  ;;  %20 = sbr.rel (!%p18_p12) target bundleno = 7 (0x7), region = 90 }
 0x134   :  { %503 = vsyncpa [#allocation3], 1 }
 0x135   :  { %505 = vsyncpa [#allocation3 + $0x1], 1 }
 0x136   :  { %506 = vsyncpa [#allocation5], 1 }
 0x137   :  { %508 = vsyncpa [#allocation5 + $0x1], 1 }

</bundles_post_ra>
